<compile_context>
chip_gen: v7x
topology: tpu7x:2x2x1
jax: 0.10.0
libtpu: 0.0.40
codegen_flags: <defaults>
</compile_context>

<pallas_src>
import jax
import jax.numpy as jnp
from jax.experimental import pallas as pl
from jax.experimental.pallas import tpu as pltpu


LANE = 128
SUBLANE = 8


def _round_up(v, m):
    return (v + m - 1) // m * m


def residual_mlp_kernel(x_ref, w1_ref, b1_ref, w2_ref, b2_ref, w3_ref, b3_ref, o_ref):
    # Residual.forward: fn(x) + x   (fn = MLP; the torch MLP does x.float()).
    x = x_ref[...].astype(jnp.float32)          # f32 copy kept for the residual add

    # bf16 MXU operands, f32 accumulation.  Biases read once, added in f32.
    h = jnp.dot(x.astype(jnp.bfloat16), w1_ref[...],
                preferred_element_type=jnp.float32) + b1_ref[...]
    h = h * jax.nn.sigmoid(h)                   # SiLU in f32 (sigmoid -> EUP slot)

    h = jnp.dot(h.astype(jnp.bfloat16), w2_ref[...],
                preferred_element_type=jnp.float32) + b2_ref[...]
    h = h * jax.nn.sigmoid(h)

    y = jnp.dot(h.astype(jnp.bfloat16), w3_ref[...],
                preferred_element_type=jnp.float32) + b3_ref[...]

    o_ref[...] = (y + x).astype(o_ref.dtype)    # residual add fused in-kernel


def residual_mlp_forward(x, params, *, tile_b=256, vmem_limit_bytes=None):
    """Compute Residual(MLP)(x) = MLP(x) + x with a single fused Pallas kernel.

    x:      [B, dim]  float32
    params: dict of w1,b1,w2,b2,w3,b3 with w* stored as [in_features, out_features].
    """
    w1, b1, w2, b2, w3, b3 = (params["w1"], params["b1"], params["w2"],
                              params["b2"], params["w3"], params["b3"])
    B, dim = x.shape
    hidden = w1.shape[1]
    if w3.shape[1] != dim:
        raise ValueError("Residual requires fn to preserve the feature dimension")

    # Lane-dense padded feature dims (multiples of 128).
    Dp = _round_up(dim, LANE)
    Hp = _round_up(hidden, LANE)

    # Batch tile: 8-aligned, at most tile_b, no bigger than the (rounded) batch.
    tb = min(_round_up(tile_b, SUBLANE), _round_up(B, SUBLANE))
    Bp = _round_up(B, tb)
    grid = (Bp // tb,)

    f32, bf16 = jnp.float32, jnp.bfloat16

    def pad2(a, rows, cols, dt):
        return jnp.pad(a, ((0, rows - a.shape[0]), (0, cols - a.shape[1]))).astype(dt)

    # Zero padding is semantics-preserving: padded lanes stay exactly 0 through
    # every matmul / SiLU and are sliced off at the end.
    xp  = pad2(x.astype(f32), Bp, Dp, f32)
    w1p = pad2(w1, Dp, Hp, bf16)
    w2p = pad2(w2, Hp, Hp, bf16)
    w3p = pad2(w3, Hp, Dp, bf16)
    b1p = pad2(b1, 1, Hp, f32)
    b2p = pad2(b2, 1, Hp, f32)
    b3p = pad2(b3, 1, Dp, f32)

    # Weights/biases are broadcast to every grid step (constant index_map), so
    # they are DMA'd once and stay resident across the batch tiles.
    def full(shape):
        return pl.BlockSpec(shape, lambda i: (0,) * len(shape))

    flops = 2 * Bp * (Dp * Hp + Hp * Hp + Hp * Dp) + 7 * Bp * Hp + 2 * Bp * Dp
    transcendentals = 2 * Bp * Hp                      # two sigmoids per hidden elem
    bytes_accessed = (xp.size * 4
                      + (w1p.size + w2p.size + w3p.size) * 2
                      + (b1p.size + b2p.size + b3p.size) * 4
                      + Bp * Dp * 4)

    compiler_params = pltpu.CompilerParams(
        dimension_semantics=("parallel",),             # batch tiles -> megacore
        vmem_limit_bytes=vmem_limit_bytes,
    )

    out = pl.pallas_call(
        residual_mlp_kernel,
        out_shape=jax.ShapeDtypeStruct((Bp, Dp), f32),
        grid_spec=pltpu.PrefetchScalarGridSpec(
            num_scalar_prefetch=0,
            grid=grid,
            in_specs=[
                pl.BlockSpec((tb, Dp), lambda i: (i, 0)),   # x tile (f32)
                full((Dp, Hp)),                             # w1 (bf16)
                full((1, Hp)),                              # b1
                full((Hp, Hp)),                             # w2 (bf16)
                full((1, Hp)),                              # b2
                full((Hp, Dp)),                             # w3 (bf16)
                full((1, Dp)),                              # b3
            ],
            out_specs=pl.BlockSpec((tb, Dp), lambda i: (i, 0)),
        ),
        compiler_params=compiler_params,
        cost_estimate=pl.CostEstimate(
            flops=flops,
            transcendentals=transcendentals,
            bytes_accessed=bytes_accessed,
        ),
    )(xp, w1p, b1p, w2p, b2p, w3p, b3p)

    return out[:B, :dim]


def init_mlp_params(key, dim, *, expansion_factor=2.0):
    """nn.Linear-style init (U(-1/sqrt(fan_in), 1/sqrt(fan_in))), dim_out == dim_in."""
    hidden = int(expansion_factor * dim)

    def linear(key, fan_in, fan_out):
        kw, kb = jax.random.split(key)
        bound = 1.0 / jnp.sqrt(fan_in)
        w = jax.random.uniform(kw, (fan_in, fan_out), jnp.float32, -bound, bound)
        b = jax.random.uniform(kb, (1, fan_out), jnp.float32, -bound, bound)
        return w, b

    k1, k2, k3 = jax.random.split(key, 3)
    w1, b1 = linear(k1, dim, hidden)
    w2, b2 = linear(k2, hidden, hidden)
    w3, b3 = linear(k3, hidden, dim)
    return dict(w1=w1, b1=b1, w2=w2, b2=b2, w3=w3, b3=b3), hidden


def residual_reference(x, params):
    """Pure-JAX reference for Residual(MLP): mirrors the kernel's bf16-operand /
    f32-accumulation precision so the comparison is apples-to-apples."""
    bf16, f32 = jnp.bfloat16, jnp.float32

    def silu(v):
        return v * jax.nn.sigmoid(v)

    xf = x.astype(f32)
    h = jnp.dot(xf.astype(bf16), params["w1"].astype(bf16),
                preferred_element_type=f32) + params["b1"]
    h = silu(h)
    h = jnp.dot(h.astype(bf16), params["w2"].astype(bf16),
                preferred_element_type=f32) + params["b2"]
    h = silu(h)
    y = jnp.dot(h.astype(bf16), params["w3"].astype(bf16),
                preferred_element_type=f32) + params["b3"]
    return y + xf


if __name__ == "__main__":
    key = jax.random.PRNGKey(0)
    kx, kp = jax.random.split(key)

    batch, dim = 16, 32                       # hidden = int(2.0 * 32) = 64
    params, hidden = init_mlp_params(kp, dim, expansion_factor=2.0)

    x = jax.random.normal(kx, (batch, dim), dtype=jnp.float32)

    out = residual_mlp_forward(x, params)
    out = jax.block_until_ready(out)

    ref = residual_reference(x, params)
    assert out.shape == (batch, dim)
    max_err = float(jnp.max(jnp.abs(out - ref)))
    assert jnp.allclose(out, ref, atol=2e-3, rtol=2e-3), f"mismatch vs reference: {max_err}"

    print("KERNEL_OK")
</pallas_src>

<mosaic_0001>
module attributes {stable_mosaic.version = 11 : i64} {
  func.func @residual_mlp_kernel(%arg0: i32, %arg1: memref<16x128xf32, #tpu.memory_space<vmem>>, %arg2: memref<128x128xbf16, #tpu.memory_space<vmem>>, %arg3: memref<1x128xf32, #tpu.memory_space<vmem>>, %arg4: memref<128x128xbf16, #tpu.memory_space<vmem>>, %arg5: memref<1x128xf32, #tpu.memory_space<vmem>>, %arg6: memref<128x128xbf16, #tpu.memory_space<vmem>>, %arg7: memref<1x128xf32, #tpu.memory_space<vmem>>, %arg8: memref<16x128xf32, #tpu.memory_space<vmem>>) attributes {dimension_semantics = [#tpu.dimension_semantics<parallel>], iteration_bounds = array<i64: 1>, scalar_prefetch = 0 : i64, scratch_operands = 0 : i64, tpu.core_type = #tpu.core_type<tc>, window_params = [{transform_indices = @transform_0, window_bounds = array<i64: 16, 128>}, {pipeline_mode = #tpu.pipeline_mode<synchronous>, transform_indices = @transform_1, window_bounds = array<i64: 128, 128>}, {pipeline_mode = #tpu.pipeline_mode<synchronous>, transform_indices = @transform_2, window_bounds = array<i64: 1, 128>}, {pipeline_mode = #tpu.pipeline_mode<synchronous>, transform_indices = @transform_3, window_bounds = array<i64: 128, 128>}, {pipeline_mode = #tpu.pipeline_mode<synchronous>, transform_indices = @transform_4, window_bounds = array<i64: 1, 128>}, {pipeline_mode = #tpu.pipeline_mode<synchronous>, transform_indices = @transform_5, window_bounds = array<i64: 128, 128>}, {pipeline_mode = #tpu.pipeline_mode<synchronous>, transform_indices = @transform_6, window_bounds = array<i64: 1, 128>}, {transform_indices = @transform_7, window_bounds = array<i64: 16, 128>}]} {
    %c0 = arith.constant 0 : index
    %c0_0 = arith.constant 0 : index
    %0 = vector.load %arg1[%c0, %c0_0] : memref<16x128xf32, #tpu.memory_space<vmem>>, vector<16x128xf32>
    %1 = arith.truncf %0 : vector<16x128xf32> to vector<16x128xbf16>
    %c0_1 = arith.constant 0 : index
    %c0_2 = arith.constant 0 : index
    %2 = vector.load %arg2[%c0_1, %c0_2] : memref<128x128xbf16, #tpu.memory_space<vmem>>, vector<128x128xbf16>
    %cst = arith.constant dense<0.000000e+00> : vector<16x128xf32>
    %3 = tpu.matmul %1, %2, %cst {dimension_numbers = #tpu.dot_dimension_numbers<[1], [0], [0], [1], [0, 0, 1, 1], [], []>} : vector<16x128xbf16>, vector<128x128xbf16>, vector<16x128xf32> -> vector<16x128xf32>
    %c0_3 = arith.constant 0 : index
    %c0_4 = arith.constant 0 : index
    %4 = vector.load %arg3[%c0_3, %c0_4] : memref<1x128xf32, #tpu.memory_space<vmem>>, vector<1x128xf32>
    %5 = vector.broadcast %4 : vector<1x128xf32> to vector<16x128xf32>
    %6 = arith.addf %3, %5 : vector<16x128xf32>
    %7 = arith.negf %6 : vector<16x128xf32>
    %8 = math.exp %7 : vector<16x128xf32>
    %cst_5 = arith.constant 1.000000e+00 : f32
    %9 = vector.broadcast %cst_5 : f32 to vector<16x128xf32>
    %10 = arith.addf %9, %8 : vector<16x128xf32>
    %11 = arith.divf %9, %10 : vector<16x128xf32>
    %12 = arith.mulf %6, %11 : vector<16x128xf32>
    %13 = arith.truncf %12 : vector<16x128xf32> to vector<16x128xbf16>
    %c0_6 = arith.constant 0 : index
    %c0_7 = arith.constant 0 : index
    %14 = vector.load %arg4[%c0_6, %c0_7] : memref<128x128xbf16, #tpu.memory_space<vmem>>, vector<128x128xbf16>
    %cst_8 = arith.constant dense<0.000000e+00> : vector<16x128xf32>
    %15 = tpu.matmul %13, %14, %cst_8 {dimension_numbers = #tpu.dot_dimension_numbers<[1], [0], [0], [1], [0, 0, 1, 1], [], []>} : vector<16x128xbf16>, vector<128x128xbf16>, vector<16x128xf32> -> vector<16x128xf32>
    %c0_9 = arith.constant 0 : index
    %c0_10 = arith.constant 0 : index
    %16 = vector.load %arg5[%c0_9, %c0_10] : memref<1x128xf32, #tpu.memory_space<vmem>>, vector<1x128xf32>
    %17 = vector.broadcast %16 : vector<1x128xf32> to vector<16x128xf32>
    %18 = arith.addf %15, %17 : vector<16x128xf32>
    %19 = arith.negf %18 : vector<16x128xf32>
    %20 = math.exp %19 : vector<16x128xf32>
    %cst_11 = arith.constant 1.000000e+00 : f32
    %21 = vector.broadcast %cst_11 : f32 to vector<16x128xf32>
    %22 = arith.addf %21, %20 : vector<16x128xf32>
    %23 = arith.divf %21, %22 : vector<16x128xf32>
    %24 = arith.mulf %18, %23 : vector<16x128xf32>
    %25 = arith.truncf %24 : vector<16x128xf32> to vector<16x128xbf16>
    %c0_12 = arith.constant 0 : index
    %c0_13 = arith.constant 0 : index
    %26 = vector.load %arg6[%c0_12, %c0_13] : memref<128x128xbf16, #tpu.memory_space<vmem>>, vector<128x128xbf16>
    %cst_14 = arith.constant dense<0.000000e+00> : vector<16x128xf32>
    %27 = tpu.matmul %25, %26, %cst_14 {dimension_numbers = #tpu.dot_dimension_numbers<[1], [0], [0], [1], [0, 0, 1, 1], [], []>} : vector<16x128xbf16>, vector<128x128xbf16>, vector<16x128xf32> -> vector<16x128xf32>
    %c0_15 = arith.constant 0 : index
    %c0_16 = arith.constant 0 : index
    %28 = vector.load %arg7[%c0_15, %c0_16] : memref<1x128xf32, #tpu.memory_space<vmem>>, vector<1x128xf32>
    %29 = vector.broadcast %28 : vector<1x128xf32> to vector<16x128xf32>
    %30 = arith.addf %27, %29 : vector<16x128xf32>
    %31 = arith.addf %30, %0 : vector<16x128xf32>
    %c0_17 = arith.constant 0 : index
    %c0_18 = arith.constant 0 : index
    %32 = vector.load %arg8[%c0_17, %c0_18] : memref<16x128xf32, #tpu.memory_space<vmem>>, vector<16x128xf32>
    tpu.vector_store %arg8[%c0_17, %c0_18], %31 {strides = array<i32>} : memref<16x128xf32, #tpu.memory_space<vmem>>, vector<16x128xf32>,
    return
  }
  func.func @transform_0(%arg0: i32) -> (i32, i32) {
    %c0_i32 = arith.constant 0 : i32
    %c0_i32_0 = arith.constant 0 : i32
    return %arg0, %c0_i32 : i32, i32
  }
  func.func @transform_1(%arg0: i32) -> (i32, i32) {
    %c0_i32 = arith.constant 0 : i32
    %c0_i32_0 = arith.constant 0 : i32
    %c0_i32_1 = arith.constant 0 : i32
    return %c0_i32, %c0_i32_0 : i32, i32
  }
  func.func @transform_2(%arg0: i32) -> (i32, i32) {
    %c0_i32 = arith.constant 0 : i32
    %c0_i32_0 = arith.constant 0 : i32
    %c0_i32_1 = arith.constant 0 : i32
    return %c0_i32, %c0_i32_0 : i32, i32
  }
  func.func @transform_3(%arg0: i32) -> (i32, i32) {
    %c0_i32 = arith.constant 0 : i32
    %c0_i32_0 = arith.constant 0 : i32
    %c0_i32_1 = arith.constant 0 : i32
    return %c0_i32, %c0_i32_0 : i32, i32
  }
  func.func @transform_4(%arg0: i32) -> (i32, i32) {
    %c0_i32 = arith.constant 0 : i32
    %c0_i32_0 = arith.constant 0 : i32
    %c0_i32_1 = arith.constant 0 : i32
    return %c0_i32, %c0_i32_0 : i32, i32
  }
  func.func @transform_5(%arg0: i32) -> (i32, i32) {
    %c0_i32 = arith.constant 0 : i32
    %c0_i32_0 = arith.constant 0 : i32
    %c0_i32_1 = arith.constant 0 : i32
    return %c0_i32, %c0_i32_0 : i32, i32
  }
  func.func @transform_6(%arg0: i32) -> (i32, i32) {
    %c0_i32 = arith.constant 0 : i32
    %c0_i32_0 = arith.constant 0 : i32
    %c0_i32_1 = arith.constant 0 : i32
    return %c0_i32, %c0_i32_0 : i32, i32
  }
  func.func @transform_7(%arg0: i32) -> (i32, i32) {
    %c0_i32 = arith.constant 0 : i32
    %c0_i32_0 = arith.constant 0 : i32
    return %arg0, %c0_i32 : i32, i32
  }
}

</mosaic_0001>

<bundles_post_ra>
// kernel: tpu_custom_call.1
= control target key start
LH: loop header
LB: loop body
LE: loop exit
PB: predicated region body
PF: predicated region fallthrough
CT: control target
= control target key end

     0   :  { %12 = vsyncpa [#allocation3], 0  ;;  %s942_s0 = inlined_call_operand.hbm [shape: f32[16,128], index: 0, kind: input, shape index: {}]   ;;  %s943_s1 = inlined_call_operand.hbm [shape: bf16[128,128], index: 1, kind: input, shape index: {}]   ;;  %s944_s2 = inlined_call_operand.vmem [shape: f32[1,128], index: 2, kind: input, shape index: {}]   ;;  %s945_s3 = inlined_call_operand.hbm [shape: bf16[128,128], index: 3, kind: input, shape index: {}]   ;;  %s946_s4 = inlined_call_operand.vmem [shape: f32[1,128], index: 4, kind: input, shape index: {}]   ;;  %s947_s5 = inlined_call_operand.hbm [shape: bf16[128,128], index: 5, kind: input, shape index: {}]   ;;  %s948_s6 = inlined_call_operand.vmem [shape: f32[1,128], index: 6, kind: input, shape index: {}]   ;;  %s949_s7 = inlined_call_operand.hbm [shape: f32[16,128], index: 7, kind: output, shape index: {}]  }
   0x1   :  { %13 = vsyncpa [#allocation6], 0 }
   0x2   :  { %14 = vsyncpa [#allocation9], 0 }
   0x3   :  { %15 = vsyncpa [#allocation4], 0  ;;  %s762_s24 = smov [#allocation5]   ;;  %s644_s28 = scalar_lea.hbm %s943_s1, 1024 }
   0x4   :  { %s33_s25 = sshll.u32 %s762_s24, 4  ;;  %p645_p0 = scmp.ne.s32.totalorder %s943_s1, %s644_s28  ;;  %s34_s25 = int_to_ptr.vmem [resolvable:$true] %s33_s25 }
   0x5   :  { %p648_p1 = scmp.lt.u32.totalorder %s644_s28, %s943_s1 }
   0x7   :  { %p650_p2 = pnand %p648_p1, %p645_p0 }
   0x9   :  { %653 = shalt.err (!%p650_p2)
}
   0xa   :  { %s654_s10 = scalar_lea.vmem %s34_s25, 1024  ;;  %p659_p4 = scmp.lt.s32.totalorder %s34_s25, %s34_s25 }
   0xb   :  { %p655_p3 = scmp.ne.s32.totalorder %s34_s25, %s654_s10  ;;  %p660_p5 = scmp.lt.s32.totalorder %s654_s10, %s654_s10 }
   0xd   :  { %p661_p6 = por %p660_p5, %p659_p4 }
   0xf   :  { %p662_p7 = pnand %p661_p6, %p655_p3 }
  0x11   :  { %665 = shalt.err (!%p662_p7)
}
  0x12   :  { %s763_s11 = smov 64   ;;  %s764_s12 = smov 4  }
  0x13   :  { %39 = dma.hbm_to_vmem [thread:$0]  %s943_s1, 1024, %s34_s25, [#allocation6], %s763_s11, %s763_s11, %s764_s12  }
  0x14   :  { %s765_s15 = smov [#allocation2]   ;;  %s666_s19 = scalar_lea.hbm %s942_s0, 256 }
  0x15   :  { %s21_s16 = sshll.u32 %s765_s15, 4  ;;  %p667_p8 = scmp.ne.s32.totalorder %s942_s0, %s666_s19  ;;  %s22_s16 = int_to_ptr.vmem [resolvable:$true] %s21_s16 }
  0x16   :  { %p670_p9 = scmp.lt.u32.totalorder %s666_s19, %s942_s0 }
  0x18   :  { %p672_p10 = pnand %p670_p9, %p667_p8 }
  0x1a   :  { %675 = shalt.err (!%p672_p10)
}
  0x1b   :  { %s676_s24 = scalar_lea.vmem %s22_s16, 256  ;;  %p681_p12 = scmp.lt.s32.totalorder %s22_s16, %s22_s16 }
  0x1c   :  { %p677_p11 = scmp.ne.s32.totalorder %s22_s16, %s676_s24  ;;  %p682_p13 = scmp.lt.s32.totalorder %s676_s24, %s676_s24 }
  0x1e   :  { %p683_p0 = por %p682_p13, %p681_p12 }
  0x20   :  { %p684_p1 = pnand %p683_p0, %p677_p11 }
  0x22   :  { %687 = shalt.err (!%p684_p1)
}
  0x23   :  { %s766_s1 = smov 128   ;;  %s767_s25 = smov 8  }
  0x24   :  { %27 = dma.hbm_to_vmem [thread:$0]  %s942_s0, 256, %s22_s16, [#allocation3], %s766_s1, %s766_s1, %s767_s25  }
  0x25   :  { %s768_s28 = smov [#allocation7]   ;;  %s769_s30 = smov [#allocation8]  }
  0x26   :  { %s47_s29 = sshll.u32 %s768_s28, 4  ;;  %s61_s8 = sshll.u32 %s769_s30, 4  ;;  %s48_s29 = int_to_ptr.vmem [resolvable:$true] %s47_s29  ;;  %s843_s8 = int_to_ptr.vmem [resolvable:$true] %s61_s8 }
  0x27   :  { %s688_s13 = scalar_lea.hbm %s945_s3, 1024 }
  0x28   :  { %p689_p2 = scmp.ne.s32.totalorder %s945_s3, %s688_s13  ;;  %p692_p3 = scmp.lt.u32.totalorder %s688_s13, %s945_s3 }
  0x2a   :  { %p694_p4 = pnand %p692_p3, %p689_p2 }
  0x2c   :  { %697 = shalt.err (!%p694_p4)
}
  0x2d   :  { %s698_s0 = scalar_lea.vmem %s48_s29, 1024  ;;  %p703_p6 = scmp.lt.s32.totalorder %s48_s29, %s48_s29 }
  0x2e   :  { %p699_p5 = scmp.ne.s32.totalorder %s48_s29, %s698_s0  ;;  %p704_p7 = scmp.lt.s32.totalorder %s698_s0, %s698_s0 }
  0x30   :  { %p705_p8 = por %p704_p7, %p703_p6 }
  0x32   :  { %p706_p9 = pnand %p705_p8, %p699_p5 }
  0x34   :  { %709 = shalt.err (!%p706_p9)
}
  0x35   :  { %53 = dma.hbm_to_vmem [thread:$0]  %s945_s3, 1024, %s48_s29, [#allocation6], %s763_s11, %s763_s11, %s764_s12  }
  0x36   :  { %s710_s22 = scalar_lea.hbm %s947_s5, 1024 }
  0x37   :  { %p711_p10 = scmp.ne.s32.totalorder %s947_s5, %s710_s22  ;;  %p714_p11 = scmp.lt.u32.totalorder %s710_s22, %s947_s5 }
  0x39   :  { %p716_p12 = pnand %p714_p11, %p711_p10 }
  0x3b   :  { %719 = shalt.err (!%p716_p12)
}
  0x3c   :  { %s720_s28 = scalar_lea.vmem %s843_s8, 1024  ;;  %p725_p0 = scmp.lt.s32.totalorder %s843_s8, %s843_s8 }
  0x3d   :  { %p721_p13 = scmp.ne.s32.totalorder %s843_s8, %s720_s28  ;;  %p726_p1 = scmp.lt.s32.totalorder %s720_s28, %s720_s28 }
  0x3f   :  { %p727_p2 = por %p726_p1, %p725_p0 }
  0x41   :  { %p728_p3 = pnand %p727_p2, %p721_p13 }
  0x43   :  { %731 = shalt.err (!%p728_p3)
}
  0x44   :  { %67 = dma.hbm_to_vmem [thread:$0]  %s947_s5, 1024, %s843_s8, [#allocation9], %s763_s11, %s763_s11, %s764_s12  }
  0x45   :  { %754 = dma.done.wait [#allocation3], 256  }
  0x46   :  { %755 = vsyncadd [#allocation3], 4294967040 }
  0x47   :  { %756 = dma.done.wait [#allocation6], 2048  }
  0x48   :  { %757 = vsyncadd [#allocation6], 4294965248 }
  0x49   :  { %758 = dma.done.wait [#allocation9], 1024  }
  0x4a   :  { %759 = vsyncadd [#allocation9], 4294966272  ;;  %v770_v0 = vmov 0.0   ;;  %vm771_vm0 = vmmov 0   ;;  %v604_v1 = vld [vmem:[#allocation5] sm:$0xff]   ;;  %v605_v2 = vld [vmem:[#allocation5 + $0x8] sm:$0xff]  }
  0x4b   :  { %533 = vmatprep.subr.bf16.mxu0 %v770_v0  ;;  %549 = vmatprep.mubr.msk.bf16.mxu0 %vm771_vm0, %v770_v0  ;;  %v606_v3 = vld [vmem:[#allocation5 + $0x10] sm:$0xff]   ;;  %v607_v4 = vld [vmem:[#allocation5 + $0x18] sm:$0xff]   ;;  %v608_v5 = vld [vmem:[#allocation5 + $0x20] sm:$0xff]   ;;  %s772_s8 = smov [#allocation10]  }
  0x4c   :  { %553 = vmatprep.subr.bf16.mxu1 %v770_v0  ;;  %569 = vmatprep.mubr.msk.bf16.mxu1 %vm771_vm0, %v770_v0  ;;  %v609_v6 = vld [vmem:[#allocation5 + $0x28] sm:$0xff]   ;;  %v610_v7 = vld [vmem:[#allocation5 + $0x30] sm:$0xff]   ;;  %v611_v8 = vld [vmem:[#allocation5 + $0x38] sm:$0xff]   ;;  %s461_s9 = sshll.u32 %s772_s8, 4  ;;  %s462_s9 = int_to_ptr.vmem [resolvable:$true] %s461_s9 }
  0x4d   :  { %534 = vmatpush3.bf16.msra.mxu0 %v604_v1  ;;  %v892_v9 = vld [vmem:[#allocation2] sm:$0xff]  ;;  %v894_v10 = vld [vmem:[#allocation2 + $0x8] sm:$0xff]  ;;  %v612_v12 = vld [vmem:[#allocation7] sm:$0xff]   ;;  %s732_s10 = scalar_lea.vmem %s462_s9, 256  ;;  %p737_p5 = scmp.lt.s32.totalorder %s462_s9, %s462_s9 }
  0x4e   :  { %535 = vmatprep.subr.bf16.mxu0 %v770_v0  ;;  %v85_v11 = vpack.c.bf16 %v894_v10, %v892_v9  ;;  %554 = vmatpush3.bf16.msra.mxu1 %v612_v12  ;;  %v613_v13 = vld [vmem:[#allocation7 + $0x8] sm:$0xff]   ;;  %v614_v14 = vld [vmem:[#allocation7 + $0x10] sm:$0xff]   ;;  %v615_v15 = vld [vmem:[#allocation7 + $0x18] sm:$0xff]   ;;  %p733_p4 = scmp.ne.s32.totalorder %s462_s9, %s732_s10  ;;  %p738_p6 = scmp.lt.s32.totalorder %s732_s10, %s732_s10 }
  0x4f   :  { %555 = vmatprep.subr.bf16.mxu1 %v770_v0  ;;  %v616_v16 = vld [vmem:[#allocation7 + $0x20] sm:$0xff]   ;;  %v617_v17 = vld [vmem:[#allocation7 + $0x28] sm:$0xff]   ;;  %v618_v18 = vld [vmem:[#allocation7 + $0x30] sm:$0xff]  }
  0x50   :  { %v619_v19 = vld [vmem:[#allocation7 + $0x38] sm:$0xff]   ;;  %v475_v20 = vld [vmem:[%s944_s2] ss:$0 sm:$0xff]  ;;  %v620_v38 = vld [vmem:[#allocation8] sm:$0xff]   ;;  %p739_p7 = por %p738_p6, %p737_p5 }
  0x51   :  { %536 = vmatpush3.bf16.msra.mxu0 %v605_v2  ;;  %v621_v39 = vld [vmem:[#allocation8 + $0x8] sm:$0xff]   ;;  %v622_v40 = vld [vmem:[#allocation8 + $0x10] sm:$0xff]   ;;  %v623_v41 = vld [vmem:[#allocation8 + $0x18] sm:$0xff]  }
  0x52   :  { %537 = vmatprep.subr.bf16.mxu0 %v770_v0  ;;  %556 = vmatpush3.bf16.msra.mxu1 %v613_v13  ;;  %v624_v42 = vld [vmem:[#allocation8 + $0x20] sm:$0xff]   ;;  %v625_v43 = vld [vmem:[#allocation8 + $0x28] sm:$0xff]   ;;  %v626_v44 = vld [vmem:[#allocation8 + $0x30] sm:$0xff]   ;;  %p740_p8 = pnand %p739_p7, %p733_p4 }
  0x53   :  { %557 = vmatprep.subr.bf16.mxu1 %v770_v0  ;;  %v627_v45 = vld [vmem:[#allocation8 + $0x38] sm:$0xff]   ;;  %v486_v46 = vld [vmem:[%s946_s4] ss:$0 sm:$0xff] }
  0x55   :  { %538 = vmatpush3.bf16.msra.mxu0 %v606_v3 }
  0x56   :  { %539 = vmatprep.subr.bf16.mxu0 %v770_v0  ;;  %558 = vmatpush3.bf16.msra.mxu1 %v614_v14 }
  0x57   :  { %559 = vmatprep.subr.bf16.mxu1 %v770_v0 }
  0x59   :  { %540 = vmatpush3.bf16.msra.mxu0 %v607_v4 }
  0x5a   :  { %541 = vmatprep.subr.bf16.mxu0 %v770_v0  ;;  %560 = vmatpush3.bf16.msra.mxu1 %v615_v15 }
  0x5b   :  { %561 = vmatprep.subr.bf16.mxu1 %v770_v0 }
  0x5d   :  { %542 = vmatpush3.bf16.msra.mxu0 %v608_v5 }
  0x5e   :  { %543 = vmatprep.subr.bf16.mxu0 %v770_v0  ;;  %562 = vmatpush3.bf16.msra.mxu1 %v616_v16 }
  0x5f   :  { %563 = vmatprep.subr.bf16.mxu1 %v770_v0 }
  0x61   :  { %544 = vmatpush3.bf16.msra.mxu0 %v609_v6 }
  0x62   :  { %545 = vmatprep.subr.bf16.mxu0 %v770_v0  ;;  %564 = vmatpush3.bf16.msra.mxu1 %v617_v17 }
  0x63   :  { %565 = vmatprep.subr.bf16.mxu1 %v770_v0 }
  0x65   :  { %546 = vmatpush3.bf16.msra.mxu0 %v610_v7 }
  0x66   :  { %547 = vmatprep.subr.bf16.mxu0 %v770_v0  ;;  %566 = vmatpush3.bf16.msra.mxu1 %v618_v18 }
  0x67   :  { %567 = vmatprep.subr.bf16.mxu1 %v770_v0 }
  0x69   :  { %548 = vmatpush3.bf16.msra.mxu0 %v611_v8 }
  0x6a   :  { %573 = vmatprep.subr.bf16.mxu0 %v770_v0  ;;  %568 = vmatpush3.bf16.msra.mxu1 %v619_v19 }
  0x6c   :  { %550 = vmatmul.mubr.bf16.vlgmr.msra.gmra.mrb[0].mxu0 %v85_v11 }
  0x6d   :  { %589 = vmatprep.mubr.msk.bf16.mxu0 %vm771_vm0, %v770_v0  ;;  %574 = vmatpush3.bf16.msra.mxu0 %v620_v38 }
  0x6e   :  { %575 = vmatprep.subr.bf16.mxu0 %v770_v0 }
  0x71   :  { %576 = vmatpush3.bf16.msra.mxu0 %v621_v39 }
  0x72   :  { %577 = vmatprep.subr.bf16.mxu0 %v770_v0 }
  0x75   :  { %578 = vmatpush3.bf16.msra.mxu0 %v622_v40 }
  0x76   :  { %579 = vmatprep.subr.bf16.mxu0 %v770_v0 }
  0x79   :  { %580 = vmatpush3.bf16.msra.mxu0 %v623_v41 }
  0x7a   :  { %581 = vmatprep.subr.bf16.mxu0 %v770_v0 }
  0x7d   :  { %582 = vmatpush3.bf16.msra.mxu0 %v624_v42 }
  0x7e   :  { %583 = vmatprep.subr.bf16.mxu0 %v770_v0 }
  0x81   :  { %584 = vmatpush3.bf16.msra.mxu0 %v625_v43 }
  0x82   :  { %585 = vmatprep.subr.bf16.mxu0 %v770_v0 }
  0x85   :  { %586 = vmatpush3.bf16.msra.mxu0 %v626_v44 }
  0x86   :  { %587 = vmatprep.subr.bf16.mxu0 %v770_v0  ;;  %v497_v0 = vld [vmem:[%s948_s6] ss:$0 sm:$0xff] }
  0x89   :  { %588 = vmatpush3.bf16.msra.mxu0 %v627_v45 }
 0x13f   :  { %v191_v21 = vpop.f32.mrb[0].mxu0 }
 0x140   :  { %v192_v22 = vadd.f32 %v475_v20, %v191_v21  ;;  %v551_v23 = vpop.f32.mrb[1].mxu0 }
 0x141   :  { %v194_v24 = vpop.f32.mrb[2].mxu0 }
 0x142   :  { %v484_v25 = vmul.f32 -1.442695, %v192_v22  ;;  %v195_v26 = vadd.f32 %v475_v20, %v194_v24  ;;  %v552_v27 = vpop.f32.mrb[3].mxu0 }
 0x144   :  { %628 = vpow2.f32 %v484_v25  ;;  %v485_v28 = vmul.f32 -1.442695, %v195_v26 }
 0x146   :  { %630 = vpow2.f32 %v485_v28 }
 0x14e   :  { %v629_v29 = vpop.eup %628 }
 0x14f   :  { %v204_v30 = vadd.f32 1.0, %v629_v29 }
 0x150   :  { %v631_v31 = vpop.eup %630 }
 0x151   :  { %632 = vrcp.f32 %v204_v30  ;;  %v205_v32 = vadd.f32 1.0, %v631_v31 }
 0x153   :  { %634 = vrcp.f32 %v205_v32 }
 0x15b   :  { %v633_v33 = vpop.eup %632 }
 0x15c   :  { %v210_v35 = vmul.f32 %v633_v33, %v192_v22 }
 0x15d   :  { %v635_v34 = vpop.eup %634 }
 0x15e   :  { %v211_v36 = vmul.f32 %v635_v34, %v195_v26 }
 0x160   :  { %v212_v37 = vpack.c.bf16 %v211_v36, %v210_v35 }
 0x162   :  { %570 = vmatmul.mubr.bf16.vlgmr.msra.gmra.mrb[0].mxu1 %v212_v37 }
 0x235   :  { %v318_v47 = vpop.f32.mrb[0].mxu1 }
 0x236   :  { %v319_v48 = vadd.f32 %v486_v46, %v318_v47  ;;  %v571_v49 = vpop.f32.mrb[1].mxu1 }
 0x237   :  { %v321_v50 = vpop.f32.mrb[2].mxu1 }
 0x238   :  { %v495_v51 = vmul.f32 -1.442695, %v319_v48  ;;  %v322_v52 = vadd.f32 %v486_v46, %v321_v50  ;;  %v572_v53 = vpop.f32.mrb[3].mxu1 }
 0x23a   :  { %636 = vpow2.f32 %v495_v51  ;;  %v496_v54 = vmul.f32 -1.442695, %v322_v52 }
 0x23c   :  { %638 = vpow2.f32 %v496_v54 }
 0x244   :  { %v637_v55 = vpop.eup %636 }
 0x245   :  { %v331_v56 = vadd.f32 1.0, %v637_v55 }
 0x246   :  { %v639_v57 = vpop.eup %638 }
 0x247   :  { %640 = vrcp.f32 %v331_v56  ;;  %v332_v58 = vadd.f32 1.0, %v639_v57 }
 0x249   :  { %642 = vrcp.f32 %v332_v58 }
 0x251   :  { %v641_v59 = vpop.eup %640 }
 0x252   :  { %v337_v61 = vmul.f32 %v641_v59, %v319_v48 }
 0x253   :  { %v643_v60 = vpop.eup %642 }
 0x254   :  { %v338_v62 = vmul.f32 %v643_v60, %v322_v52 }
 0x256   :  { %v339_v63 = vpack.c.bf16 %v338_v62, %v337_v61 }
 0x258   :  { %590 = vmatmul.mubr.bf16.vlgmr.msra.gmra.mrb[4].mxu0 %v339_v63 }
 0x32b   :  { %v445_v1 = vpop.f32.mrb[4].mxu0 }
 0x32c   :  { %v446_v2 = vadd.f32 %v497_v0, %v445_v1  ;;  %v591_v3 = vpop.f32.mrb[5].mxu0 }
 0x32d   :  { %v448_v4 = vpop.f32.mrb[6].mxu0 }
 0x32e   :  { %v452_v5 = vadd.f32 %v446_v2, %v892_v9  ;;  %v449_v6 = vadd.f32 %v497_v0, %v448_v4  ;;  %v592_v7 = vpop.f32.mrb[7].mxu0 }
 0x330   :  { %454 = vst [vmem:[#allocation10] sm:$0xff] %v452_v5  ;;  %v453_v8 = vadd.f32 %v449_v6, %v894_v10 }
 0x332   :  { %455 = vst [vmem:[#allocation10 + $0x8] sm:$0xff] %v453_v8 }
 0x333   :  { %743 = shalt.err (!%p740_p8)
}
 0x334   :  { %s744_s14 = scalar_lea.hbm %s949_s7, 256 }
 0x335   :  { %p745_p9 = scmp.ne.s32.totalorder %s949_s7, %s744_s14  ;;  %p748_p10 = scmp.lt.u32.totalorder %s744_s14, %s949_s7 }
 0x337   :  { %p750_p11 = pnand %p748_p10, %p745_p9 }
 0x339   :  { %753 = shalt.err (!%p750_p11)
}
 0x33a   :  { %467 = dma.vmem_to_hbm [thread:$0]  %s462_s9, 256, %s949_s7, [#allocation4], %s766_s1, %s766_s1, %s767_s25  }
 0x33b   :  { %760 = dma.done.wait [#allocation4], 256  }
 0x33c   :  { %761 = vsyncadd [#allocation4], 4294967040 }
 0x33d   :  { %471 = vsyncpa [#allocation3], 1 }
 0x33e   :  { %472 = vsyncpa [#allocation6], 1 }
 0x33f   :  { %473 = vsyncpa [#allocation9], 1 }
 0x340   :  { %474 = vsyncpa [#allocation4], 1 }

</bundles_post_ra>
